<compile_context>
chip_gen: v7x
topology: tpu7x:2x2x1
jax: 0.10.0
libtpu: 0.0.40
codegen_flags: <defaults>
</compile_context>

<pallas_src>
import jax
import jax.numpy as jnp
from jax.experimental import pallas as pl
from jax.experimental.pallas import tpu as pltpu

INIT_W = 0.003


def _value_kernel(x_ref, w_ref, b_ref, o_ref):
    # x_ref: (TB, D) VMEM    w_ref: (1, D) VMEM    b_ref: (1, 1) SMEM
    # o_ref: (TB, 1) VMEM  -- module-native column layout; per-row independent,
    # so the clipped boundary block only writes back the valid rows.
    x = x_ref[...].astype(jnp.float32)
    w = w_ref[...].astype(jnp.float32)
    prod = x * w                                      # VPU: (1, D) broadcast over rows
    acc = jnp.sum(prod, axis=1, keepdims=True)        # XLU lane reduce -> (TB, 1)
    o_ref[...] = (acc + b_ref[0, 0]).astype(o_ref.dtype)


def _round_up(n, m):
    return ((n + m - 1) // m) * m


def _pick_tile_b(batch, n_input, *, target_x_block_bytes=8 << 20,
                 total_vmem_budget=40 << 20):
    """Pick the batch tile and report the real resident VMEM footprint.

    Accounts for lane/sublane padding of every resident buffer so the explicit
    vmem_limit_bytes we request is honest on v5e (16 MiB scoped default),
    v6e (32 MiB default / 128 MiB physical) and v7x (64 MiB physical).
    """
    d_pad = _round_up(max(n_input, 128), 128)         # lane-padded feature dim
    row_bytes = d_pad * 4                             # f32 row in VMEM
    b_ceil = _round_up(max(batch, 1), 128)

    # Bytes-based target (no hard row cap).
    tb = max(128, (target_x_block_bytes // row_bytes) // 128 * 128)
    tb = min(tb, b_ceil)

    # v7x: guarantee >= 2 grid steps when there is enough batch so the
    # "parallel" axis spans both TensorCores (no-op on single-TC v5e/v6e).
    if batch >= 256:
        tb = min(tb, max(128, (b_ceil // 2) // 128 * 128))

    def footprint(t):
        x_bytes = 2 * t * row_bytes                   # double-buffered x tile
        w_bytes = 2 * 8 * d_pad * 4                   # (1,D) block sublane-padded to (8,d_pad)
        o_bytes = 2 * t * 128 * 4                     # (t,1) block lane-padded to (t,128)
        return x_bytes + w_bytes + o_bytes

    while tb > 128 and footprint(tb) > total_vmem_budget:
        tb -= 128

    return tb, footprint(tb)


@jax.jit
def value_variable_forward_pallas(x, weight, bias):
    """Pallas forward pass of ValueVariable: x @ weight.T + bias.

    Args:
      x:      [B, D] float32 (bf16 also fine: upcast + f32 accumulation in-kernel)
      weight: [1, D] float32 (PyTorch nn.Linear weight layout, un-transposed)
      bias:   [1]    float32
    Returns:
      [B, 1] float32 value estimates.
    """
    B, D = x.shape
    tile_b, footprint = _pick_tile_b(B, D)
    # Explicit scoped-VMEM limit derived from the real footprint (+ headroom),
    # clamped well under v7x's 64 MiB physical VMEM.
    vmem_limit = int(min(48 << 20, max(16 << 20, footprint + (4 << 20))))

    b_smem = bias.reshape(1, 1).astype(jnp.float32)

    return pl.pallas_call(
        _value_kernel,
        out_shape=jax.ShapeDtypeStruct((B, 1), jnp.float32),
        grid=(pl.cdiv(B, tile_b),),                   # no jnp.pad: boundary block is clipped
        in_specs=[
            pl.BlockSpec((tile_b, D), lambda i: (i, 0)),   # streamed batch tile
            pl.BlockSpec((1, D), lambda i: (0, 0)),        # weight: constant index -> resident
            pl.BlockSpec(memory_space=pltpu.SMEM),         # bias scalar in SMEM
        ],
        out_specs=pl.BlockSpec((tile_b, 1), lambda i: (i, 0)),
        compiler_params=pltpu.CompilerParams(
            dimension_semantics=("parallel",),             # shard batch over TCs (v7x)
            vmem_limit_bytes=vmem_limit,
        ),
    )(x, weight, b_smem)


def value_variable_forward(x, weight, bias):
    """Dispatcher: at toy sizes a standalone kernel is pure launch overhead plus
    padded DMA, so fall back to plain XLA there."""
    B, D = x.shape
    if B * max(D, 128) < (1 << 16):
        return (x @ weight.T + bias).astype(jnp.float32)
    return value_variable_forward_pallas(x, weight, bias)

# TODO(synk): in production this value head should be fused into the kernel
# producing `x` (the critic trunk); it is kept standalone here for parity with
# the PyTorch module.


if __name__ == "__main__":
    key = jax.random.PRNGKey(0)
    k_x, k_w, k_b, k_x2 = jax.random.split(key, 4)

    # Toy shape matching the module config.
    B, n_input = 8, 32
    x = jax.random.normal(k_x, (B, n_input), dtype=jnp.float32)
    # Deterministic init matching nn.init.uniform_(-INIT_W, INIT_W)
    weight = jax.random.uniform(
        k_w, (1, n_input), minval=-INIT_W, maxval=INIT_W, dtype=jnp.float32
    )
    bias = jax.random.uniform(
        k_b, (1,), minval=-INIT_W, maxval=INIT_W, dtype=jnp.float32
    )

    out = jax.block_until_ready(value_variable_forward_pallas(x, weight, bias))
    ref = x @ weight.T + bias
    assert out.shape == (B, 1)
    assert jnp.allclose(out, ref, atol=1e-5, rtol=1e-5)

    # Ragged batch (not a multiple of the tile) to exercise the cdiv grid and
    # boundary-block clipping path (no jnp.pad in the wrapper any more).
    B2 = 1000
    x2 = jax.random.normal(k_x2, (B2, n_input), dtype=jnp.float32)
    out2 = jax.block_until_ready(value_variable_forward_pallas(x2, weight, bias))
    ref2 = x2 @ weight.T + bias
    assert out2.shape == (B2, 1)
    assert jnp.allclose(out2, ref2, atol=1e-5, rtol=1e-5)

    print("KERNEL_OK")
</pallas_src>

<mosaic_0001>
module attributes {stable_mosaic.version = 11 : i64} {
  func.func @_value_kernel(%arg0: i32, %arg1: memref<128x32xf32, #tpu.memory_space<vmem>>, %arg2: memref<1x32xf32, #tpu.memory_space<vmem>>, %arg3: memref<1x1xf32, #tpu.memory_space<smem>>, %arg4: memref<128x1xf32, #tpu.memory_space<vmem>>) attributes {dimension_semantics = [#tpu.dimension_semantics<parallel>], iteration_bounds = array<i64: 1>, scalar_prefetch = 0 : i64, scratch_operands = 0 : i64, tpu.core_type = #tpu.core_type<tc>, window_params = [{transform_indices = @transform_0, window_bounds = array<i64: 128, 32>}, {pipeline_mode = #tpu.pipeline_mode<synchronous>, transform_indices = @transform_1, window_bounds = array<i64: 1, 32>}, {transform_indices = @transform_2, window_bounds = array<i64: 1, 1>}, {transform_indices = @transform_3, window_bounds = array<i64: 128, 1>}]} {
    %c0 = arith.constant 0 : index
    %c0_0 = arith.constant 0 : index
    %0 = vector.load %arg1[%c0, %c0_0] : memref<128x32xf32, #tpu.memory_space<vmem>>, vector<128x32xf32>
    %c0_1 = arith.constant 0 : index
    %c0_2 = arith.constant 0 : index
    %1 = vector.load %arg2[%c0_1, %c0_2] : memref<1x32xf32, #tpu.memory_space<vmem>>, vector<1x32xf32>
    %2 = vector.broadcast %1 : vector<1x32xf32> to vector<128x32xf32>
    %3 = arith.mulf %0, %2 : vector<128x32xf32>
    %cst = arith.constant dense<0.000000e+00> : vector<128xf32>
    %4 = vector.multi_reduction <add>, %3, %cst [1] : vector<128x32xf32> to vector<128xf32>
    %5 = vector.shape_cast %4 : vector<128xf32> to vector<128x1xf32>
    %c0_3 = arith.constant 0 : index
    %c0_4 = arith.constant 0 : index
    %6 = memref.load %arg3[%c0_3, %c0_4] : memref<1x1xf32, #tpu.memory_space<smem>>
    %7 = vector.broadcast %6 : f32 to vector<128x1xf32>
    %8 = arith.addf %5, %7 : vector<128x1xf32>
    %c0_5 = arith.constant 0 : index
    %c0_6 = arith.constant 0 : index
    %9 = vector.load %arg4[%c0_5, %c0_6] : memref<128x1xf32, #tpu.memory_space<vmem>>, vector<128x1xf32>
    tpu.vector_store %arg4[%c0_5, %c0_6], %8 {strides = array<i32>} : memref<128x1xf32, #tpu.memory_space<vmem>>, vector<128x1xf32>,
    return
  }
  func.func @transform_0(%arg0: i32) -> (i32, i32) {
    %c0_i32 = arith.constant 0 : i32
    %c0_i32_0 = arith.constant 0 : i32
    return %arg0, %c0_i32 : i32, i32
  }
  func.func @transform_1(%arg0: i32) -> (i32, i32) {
    %c0_i32 = arith.constant 0 : i32
    %c0_i32_0 = arith.constant 0 : i32
    %c0_i32_1 = arith.constant 0 : i32
    return %c0_i32, %c0_i32_0 : i32, i32
  }
  func.func @transform_2(%arg0: i32) -> (i32, i32) {
    %c0_i32 = arith.constant 0 : i32
    %c0_i32_0 = arith.constant 0 : i32
    %c0_i32_1 = arith.constant 0 : i32
    return %c0_i32, %c0_i32_0 : i32, i32
  }
  func.func @transform_3(%arg0: i32) -> (i32, i32) {
    %c0_i32 = arith.constant 0 : i32
    %c0_i32_0 = arith.constant 0 : i32
    return %arg0, %c0_i32 : i32, i32
  }
}

</mosaic_0001>

<bundles_post_ra>
// kernel: value_variable_forward_pallas.1
= control target key start
LH: loop header
LB: loop body
LE: loop exit
PB: predicated region body
PF: predicated region fallthrough
CT: control target
= control target key end

     0   :  { %9 = vsyncpa [#allocation4], 0  ;;  %s281_s0 = inlined_call_operand.hbm [shape: f32[8,32], index: 0, kind: input, shape index: {}]   ;;  %s282_s1 = inlined_call_operand.vmem [shape: f32[1,32], index: 1, kind: input, shape index: {}]   ;;  %s283_s2 = inlined_call_operand.<no memory space> [shape: f32[1,1], index: 2, kind: input, shape index: {}]   ;;  %s284_s3 = inlined_call_operand.vmem [shape: f32[8,1], index: 3, kind: output, shape index: {}]  }
   0x1   :  { %14 = vsyncadd [#allocation4], 1920  ;;  %s221_s12 = smov [#allocation3]   ;;  %s197_s16 = scalar_lea.hbm %s281_s0, 128 }
   0x2   :  { %s15_s13 = sshll.u32 %s221_s12, 4  ;;  %p198_p0 = scmp.ne.s32.totalorder %s281_s0, %s197_s16  ;;  %s16_s13 = int_to_ptr.vmem [resolvable:$true] %s15_s13 }
   0x3   :  { %p201_p1 = scmp.lt.u32.totalorder %s197_s16, %s281_s0 }
   0x5   :  { %p203_p2 = pnand %p201_p1, %p198_p0 }
   0x7   :  { %206 = shalt.err (!%p203_p2)
}
   0x8   :  { %s207_s21 = scalar_lea.vmem %s16_s13, 128  ;;  %s211_s22 = scalar_lea.vmem %s16_s13, 2048 }
   0x9   :  { %p208_p3 = scmp.ne.s32.totalorder %s16_s13, %s207_s21  ;;  %p212_p4 = scmp.lt.s32.totalorder %s16_s13, %s16_s13 }
   0xa   :  { %p213_p5 = scmp.lt.s32.totalorder %s211_s22, %s207_s21 }
   0xc   :  { %p214_p6 = por %p213_p5, %p212_p4 }
   0xe   :  { %p215_p7 = pnand %p214_p6, %p208_p3 }
  0x10   :  { %218 = shalt.err (!%p215_p7)
}
  0x11   :  { %s222_s23 = smov 128   ;;  %s223_s24 = smov 8  }
  0x12   :  { %21 = dma.hbm_to_vmem [thread:$0]  %s281_s0, 128, %s16_s13, [#allocation4], %s222_s23, %s222_s23, %s223_s24  }
  0x13   :  { %219 = dma.done.wait [#allocation4], 2048  }
  0x14   :  { %220 = vsyncadd [#allocation4], 4294965248  ;;  %v31_v0 = vld [vmem:[#allocation3 + $0x10] sm:$0xff]  ;;  %v193_v1 = vld [vmem:[%s282_s1] ss:$0 sm:$0xff]  ;;  %vm68_vm0 = vcmask 261120   ;;  %v118_v49 = vstv %s283_s2 }
  0x15   :  { %v29_v2 = vld [vmem:[#allocation3] sm:$0xff]  ;;  %v54_v3 = vmul.f32 %v193_v1, %v31_v0  ;;  %v32_v5 = vld [vmem:[#allocation3 + $0x18] sm:$0xff]  ;;  %v30_v6 = vld [vmem:[#allocation3 + $0x8] sm:$0xff]  ;;  %vm135_vm1 = vcmask 7168  }
  0x16   :  { %v52_v4 = vmul.f32 %v193_v1, %v29_v2  ;;  %v55_v7 = vmul.f32 %v193_v1, %v32_v5  ;;  %v53_v8 = vmul.f32 %v193_v1, %v30_v6  ;;  %v34_v9 = vld [vmem:[#allocation3 + $0x28] sm:$0xff]  ;;  %v33_v10 = vld [vmem:[#allocation3 + $0x20] sm:$0xff]  ;;  %v36_v17 = vld [vmem:[#allocation3 + $0x38] sm:$0xff] }
  0x17   :  { %v75_v11 = vsel %vm68_vm0, %v54_v3, 0.0  ;;  %v57_v15 = vmul.f32 %v193_v1, %v34_v9  ;;  %v56_v16 = vmul.f32 %v193_v1, %v33_v10  ;;  %v35_v18 = vld [vmem:[#allocation3 + $0x30] sm:$0xff]  ;;  %v59_v21 = vmul.f32 %v193_v1, %v36_v17  ;;  %v38_v23 = vld [vmem:[#allocation3 + $0x48] sm:$0xff]  ;;  %v37_v24 = vld [vmem:[#allocation3 + $0x40] sm:$0xff] }
  0x18   :  { %v69_v12 = vsel %vm68_vm0, %v52_v4, 0.0  ;;  %76 = vadd.xlane.f32.xlu1 %v75_v11  ;;  %v78_v13 = vsel %vm68_vm0, %v55_v7, 0.0  ;;  %v72_v14 = vsel %vm68_vm0, %v53_v8, 0.0  ;;  %v58_v22 = vmul.f32 %v193_v1, %v35_v18  ;;  %v40_v29 = vld [vmem:[#allocation3 + $0x58] sm:$0xff]  ;;  %v39_v30 = vld [vmem:[#allocation3 + $0x50] sm:$0xff]  ;;  %v42_v35 = vld [vmem:[#allocation3 + $0x68] sm:$0xff] }
  0x19   :  { %70 = vadd.xlane.f32.xlu0 %v69_v12  ;;  %v84_v19 = vsel %vm68_vm0, %v57_v15, 0.0  ;;  %v81_v20 = vsel %vm68_vm0, %v56_v16, 0.0  ;;  %v90_v25 = vsel %vm68_vm0, %v59_v21, 0.0  ;;  %v61_v27 = vmul.f32 %v193_v1, %v38_v23  ;;  %v41_v36 = vld [vmem:[#allocation3 + $0x60] sm:$0xff]  ;;  %v44_v41 = vld [vmem:[#allocation3 + $0x78] sm:$0xff]  ;;  %v43_v42 = vld [vmem:[#allocation3 + $0x70] sm:$0xff] }
  0x1a   :  { %v87_v26 = vsel %vm68_vm0, %v58_v22, 0.0  ;;  %v60_v28 = vmul.f32 %v193_v1, %v37_v24  ;;  %v63_v33 = vmul.f32 %v193_v1, %v40_v29  ;;  %v62_v34 = vmul.f32 %v193_v1, %v39_v30 }
  0x1b   :  { %v96_v31 = vsel %vm68_vm0, %v61_v27, 0.0  ;;  %v65_v39 = vmul.f32 %v193_v1, %v42_v35  ;;  %v64_v40 = vmul.f32 %v193_v1, %v41_v36  ;;  %v67_v45 = vmul.f32 %v193_v1, %v44_v41 }
  0x1c   :  { %79 = vadd.xlane.f32.xlu1 %v78_v13  ;;  %v93_v32 = vsel %vm68_vm0, %v60_v28, 0.0  ;;  %v102_v37 = vsel %vm68_vm0, %v63_v33, 0.0  ;;  %v99_v38 = vsel %vm68_vm0, %v62_v34, 0.0  ;;  %v66_v46 = vmul.f32 %v193_v1, %v43_v42 }
  0x1d   :  { %73 = vadd.xlane.f32.xlu0 %v72_v14  ;;  %v108_v43 = vsel %vm68_vm0, %v65_v39, 0.0  ;;  %v105_v44 = vsel %vm68_vm0, %v64_v40, 0.0  ;;  %v114_v47 = vsel %vm68_vm0, %v67_v45, 0.0 }
  0x1e   :  { %v111_v48 = vsel %vm68_vm0, %v66_v46, 0.0 }
  0x20   :  { %85 = vadd.xlane.f32.xlu1 %v84_v19 }
  0x21   :  { %82 = vadd.xlane.f32.xlu0 %v81_v20 }
  0x24   :  { %91 = vadd.xlane.f32.xlu1 %v90_v25 }
  0x25   :  { %88 = vadd.xlane.f32.xlu0 %v87_v26 }
  0x28   :  { %97 = vadd.xlane.f32.xlu1 %v96_v31 }
  0x29   :  { %94 = vadd.xlane.f32.xlu0 %v93_v32 }
  0x2c   :  { %103 = vadd.xlane.f32.xlu1 %v102_v37 }
  0x2d   :  { %100 = vadd.xlane.f32.xlu0 %v99_v38 }
  0x30   :  { %109 = vadd.xlane.f32.xlu1 %v108_v43 }
  0x31   :  { %106 = vadd.xlane.f32.xlu0 %v105_v44 }
  0x34   :  { %115 = vadd.xlane.f32.xlu1 %v114_v47 }
  0x35   :  { %112 = vadd.xlane.f32.xlu0 %v111_v48 }
  0xa5   :  { %v77_v50 = vpop.xlane.xlu1 %76 }
  0xa6   :  { %v71_v51 = vpop.xlane.xlu0 %70 }
  0xa7   :  { %v119_v52 = vadd.f32 %v118_v49, %v71_v51 }
  0xa9   :  { %136 = vst.msk [vmem:[#allocation5] sm:$0xff] %vm135_vm1, %v119_v52  ;;  %v80_v53 = vpop.xlane.xlu1 %79 }
  0xaa   :  { %v74_v54 = vpop.xlane.xlu0 %73 }
  0xad   :  { %v86_v55 = vpop.xlane.xlu1 %85 }
  0xae   :  { %v83_v56 = vpop.xlane.xlu0 %82 }
  0xb0   :  { %v181_v57 = vld [vmem:[#allocation5] sm:$0xff] }
  0xb1   :  { %182 = vst [vmem:[%s284_s3] sm:$0xff] %v181_v57  ;;  %v92_v58 = vpop.xlane.xlu1 %91 }
  0xb2   :  { %v89_v59 = vpop.xlane.xlu0 %88 }
  0xb5   :  { %v98_v60 = vpop.xlane.xlu1 %97 }
  0xb6   :  { %v95_v61 = vpop.xlane.xlu0 %94 }
  0xb9   :  { %v104_v62 = vpop.xlane.xlu1 %103 }
  0xba   :  { %v101_v63 = vpop.xlane.xlu0 %100 }
  0xbd   :  { %v110_v0 = vpop.xlane.xlu1 %109 }
  0xbe   :  { %v107_v1 = vpop.xlane.xlu0 %106 }
  0xc1   :  { %v116_v2 = vpop.xlane.xlu1 %115 }
  0xc2   :  { %v113_v3 = vpop.xlane.xlu0 %112 }
  0xc3   :  { %188 = vsyncpa [#allocation4], 1 }

</bundles_post_ra>
